<compile_context>
chip_gen: v7x
topology: tpu7x:2x2x1
jax: 0.10.0
libtpu: 0.0.40
codegen_flags: <defaults>
</compile_context>

<pallas_src>
import jax
import jax.numpy as jnp
from jax.experimental import pallas as pl
from jax.experimental.pallas import tpu as pltpu

D_TOTAL = 19       # objectness + coords + shape + size + material + color
COLOR_START = 11
COLOR_END = 19
N_COLORS = COLOR_END - COLOR_START   # 8


def _color_valuation_kernel(zc_ref, a_ref, o_ref):
    # zc_ref: (8, TILE_B)  a_ref: (8, TILE_B)  o_ref: (1, TILE_B)
    zc = zc_ref[...].astype(jnp.float32)
    a = a_ref[...].astype(jnp.float32)
    # Reduce over the 8 color channels (sublane axis); result stays lane-dense.
    o_ref[...] = jnp.sum(a * zc, axis=0, keepdims=True)


def slot_attention_color_valuation(z, a, *, max_tile_b=8192):
    """Pallas-backed forward of SlotAttentionColorValuationFunction.

    Args:
      z: (B, 19) float array (object-centric representation).
      a: (B, 8)  float one-hot color query (expanded to batch).
      max_tile_b: batch-tile cap (multiple of 128).
    Returns:
      (B,) float32 probabilities, (a * z[:, 11:19]).sum(axis=1).
    """
    B, D = z.shape
    assert D == D_TOTAL, f"expected z feature dim {D_TOTAL}, got {D}"
    assert a.shape == (B, N_COLORS), a.shape

    # Layout plumbing (single fused XLA copy): drop the dead columns and put
    # batch on the lane axis.
    # TODO(synk): ideally fuse this slice/transpose into the producer of z so
    # the 11 unused feature columns never round-trip through HBM.
    zc_t = jnp.transpose(z[:, COLOR_START:COLOR_END])    # (8, B)
    a_t = jnp.transpose(a)                               # (8, B)

    # Tile the batch (lane) axis.  A block equal to the full axis is always
    # layout-legal; otherwise use a multiple of 128 and let Pallas pad the
    # boundary block (reads padded, OOB output writes dropped).
    tile_b = B if B <= max_tile_b else max_tile_b
    grid = (pl.cdiv(B, tile_b),)

    out = pl.pallas_call(
        _color_valuation_kernel,
        out_shape=jax.ShapeDtypeStruct((1, B), jnp.float32),
        grid_spec=pltpu.PrefetchScalarGridSpec(
            num_scalar_prefetch=0,
            grid=grid,
            in_specs=[
                pl.BlockSpec((N_COLORS, tile_b), lambda i: (0, i)),
                pl.BlockSpec((N_COLORS, tile_b), lambda i: (0, i)),
            ],
            out_specs=pl.BlockSpec((1, tile_b), lambda i: (0, i)),
        ),
        compiler_params=pltpu.CompilerParams(
            dimension_semantics=("parallel",),   # v7x: shard batch across TCs
        ),
    )(zc_t, a_t)
    return out[0]


def _reference(z, a):
    return jnp.sum(
        a.astype(jnp.float32) * z[:, COLOR_START:COLOR_END].astype(jnp.float32),
        axis=1,
    )


if __name__ == "__main__":
    key = jax.random.PRNGKey(0)
    kz, ka = jax.random.split(key)

    # --- small case consistent with the module: batch=2 --------------------
    B = 2
    z = jax.random.uniform(kz, (B, D_TOTAL), dtype=jnp.float32)
    color_idx = 3  # 'yellow'
    a = jnp.broadcast_to(
        jax.nn.one_hot(color_idx, N_COLORS, dtype=jnp.float32), (B, N_COLORS)
    )

    out = jax.block_until_ready(slot_attention_color_valuation(z, a))
    ref = _reference(z, a)
    assert out.shape == (B,)
    assert jnp.allclose(out, ref, atol=1e-6), (out, ref)

    # --- exercise the tiled / boundary-padded path (multi-step grid) -------
    B2 = 300
    z2 = jax.random.uniform(ka, (B2, D_TOTAL), dtype=jnp.float32)
    a2 = jnp.broadcast_to(
        jax.nn.one_hot(5, N_COLORS, dtype=jnp.float32), (B2, N_COLORS)
    )
    out2 = jax.block_until_ready(
        slot_attention_color_valuation(z2, a2, max_tile_b=128)
    )
    assert out2.shape == (B2,)
    assert jnp.allclose(out2, _reference(z2, a2), atol=1e-6)

    print("KERNEL_OK")
</pallas_src>

<mosaic_0001>
module attributes {stable_mosaic.version = 11 : i64} {
  func.func @_color_valuation_kernel(%arg0: i32, %arg1: memref<8x2xf32, #tpu.memory_space<vmem>>, %arg2: memref<8x2xf32, #tpu.memory_space<vmem>>, %arg3: memref<1x2xf32, #tpu.memory_space<vmem>>) attributes {dimension_semantics = [#tpu.dimension_semantics<parallel>], iteration_bounds = array<i64: 1>, scalar_prefetch = 0 : i64, scratch_operands = 0 : i64, tpu.core_type = #tpu.core_type<tc>, window_params = [{transform_indices = @transform_0, window_bounds = array<i64: 8, 2>}, {transform_indices = @transform_1, window_bounds = array<i64: 8, 2>}, {transform_indices = @transform_2, window_bounds = array<i64: 1, 2>}]} {
    %c0 = arith.constant 0 : index
    %c0_0 = arith.constant 0 : index
    %0 = vector.load %arg1[%c0, %c0_0] : memref<8x2xf32, #tpu.memory_space<vmem>>, vector<8x2xf32>
    %c0_1 = arith.constant 0 : index
    %c0_2 = arith.constant 0 : index
    %1 = vector.load %arg2[%c0_1, %c0_2] : memref<8x2xf32, #tpu.memory_space<vmem>>, vector<8x2xf32>
    %2 = arith.mulf %1, %0 : vector<8x2xf32>
    %cst = arith.constant dense<0.000000e+00> : vector<2xf32>
    %3 = vector.multi_reduction <add>, %2, %cst [0] : vector<8x2xf32> to vector<2xf32>
    %4 = vector.shape_cast %3 : vector<2xf32> to vector<1x2xf32>
    %c0_3 = arith.constant 0 : index
    %c0_4 = arith.constant 0 : index
    %5 = vector.load %arg3[%c0_3, %c0_4] : memref<1x2xf32, #tpu.memory_space<vmem>>, vector<1x2xf32>
    tpu.vector_store %arg3[%c0_3, %c0_4], %4 {strides = array<i32>} : memref<1x2xf32, #tpu.memory_space<vmem>>, vector<1x2xf32>,
    return
  }
  func.func @transform_0(%arg0: i32) -> (i32, i32) {
    %c0_i32 = arith.constant 0 : i32
    %c0_i32_0 = arith.constant 0 : i32
    return %c0_i32, %arg0 : i32, i32
  }
  func.func @transform_1(%arg0: i32) -> (i32, i32) {
    %c0_i32 = arith.constant 0 : i32
    %c0_i32_0 = arith.constant 0 : i32
    return %c0_i32, %arg0 : i32, i32
  }
  func.func @transform_2(%arg0: i32) -> (i32, i32) {
    %c0_i32 = arith.constant 0 : i32
    %c0_i32_0 = arith.constant 0 : i32
    return %c0_i32, %arg0 : i32, i32
  }
}

</mosaic_0001>

<bundles_post_ra>
// kernel: tpu_custom_call.1
= control target key start
LH: loop header
LB: loop body
LE: loop exit
PB: predicated region body
PF: predicated region fallthrough
CT: control target
= control target key end

     0   :  { %vm15_vm0 = vcmask 15360   ;;  %s98_s0 = inlined_call_operand.vmem [shape: f32[8,2], index: 0, kind: input, shape index: {}]   ;;  %s99_s1 = inlined_call_operand.vmem [shape: f32[8,2], index: 1, kind: input, shape index: {}]   ;;  %s100_s2 = inlined_call_operand.hbm [shape: f32[1,2], index: 2, kind: output, shape index: {}]  }
   0x1   :  { %v12_v0 = vld [vmem:[%s98_s0] sm:$0xff] }
   0x2   :  { %v13_v1 = vld [vmem:[%s99_s1] sm:$0xff] }
   0x3   :  { %7 = vsyncpa [#allocation3], 0  ;;  %v14_v2 = vmul.f32 %v13_v1, %v12_v0  ;;  %s64_s13 = smov [#allocation2]   ;;  %vm23_vm1 = vcmask 8192  }
   0x4   :  { %s31_s14 = sshll.u32 %s64_s13, 4  ;;  %s32_s14 = int_to_ptr.vmem [resolvable:$true] %s31_s14 }
   0x5   :  { %v16_v3 = vsel %vm15_vm0, %v14_v2, 0.0  ;;  %s40_s0 = scalar_lea.vmem %s32_s14, 16  ;;  %s44_s15 = scalar_lea.vmem %s32_s14, 32 }
   0x6   :  { %v17_v4 = vrot.slane %v16_v3, 4  ;;  %p41_p0 = scmp.ne.s32.totalorder %s32_s14, %s40_s0  ;;  %p45_p1 = scmp.lt.s32.totalorder %s32_s14, %s32_s14 }
   0x7   :  { %p46_p2 = scmp.lt.s32.totalorder %s44_s15, %s40_s0 }
   0x8   :  { %v18_v5 = vadd.f32 %v17_v4, %v16_v3 }
   0x9   :  { %p47_p3 = por %p46_p2, %p45_p1 }
   0xa   :  { %v19_v6 = vrot.slane %v18_v5, 2 }
   0xb   :  { %p48_p4 = pnand %p47_p3, %p41_p0 }
   0xc   :  { %v20_v7 = vadd.f32 %v19_v6, %v18_v5 }
   0xe   :  { %v21_v8 = vrot.slane %v20_v7, 1 }
  0x10   :  { %v22_v9 = vadd.f32 %v21_v8, %v20_v7 }
  0x12   :  { %24 = vst.msk [vmem:[#allocation2] sm:$0x1] %vm23_vm1, %v22_v9 }
  0x13   :  { %51 = shalt.err (!%p48_p4)
}
  0x14   :  { %s52_s17 = scalar_lea.hbm %s100_s2, 16 }
  0x15   :  { %p53_p5 = scmp.ne.s32.totalorder %s100_s2, %s52_s17  ;;  %p56_p6 = scmp.lt.u32.totalorder %s52_s17, %s100_s2 }
  0x17   :  { %p58_p7 = pnand %p56_p6, %p53_p5 }
  0x19   :  { %61 = shalt.err (!%p58_p7)
}
  0x1a   :  { %34 = dma.vmem_to_hbm [thread:$0]  %s32_s14, 16, %s100_s2, [#allocation3]  }
  0x1b   :  { %62 = dma.done.wait [#allocation3], 16  }
  0x1c   :  { %63 = vsyncadd [#allocation3], 4294967280 }
  0x1d   :  { %38 = vsyncpa [#allocation3], 1 }

</bundles_post_ra>
